<compile_context>
chip_gen: v6e
topology: v6e:2x2x1
jax: 0.10.0
libtpu: 0.0.40
codegen_flags: <defaults>
</compile_context>

<pallas_src>
import functools

import jax
import jax.numpy as jnp
from jax.experimental import pallas as pl
from jax.experimental.pallas import tpu as pltpu

IN_FEATURES = 28 * 28        # 784 (multiple of 8 -> no contraction padding)
HIDDEN = 64
OUT_FEATURES = 10

HIDDEN_PAD = 128             # lane-dense hidden layer (VMEM-internal, cheap)
OUT_PAD = 16                 # small output block; masked stores are fine here

DEFAULT_BLOCK_B = 2048       # ~3 MiB bf16 x-tile; x2 buffers fits all gens
MIN_GRID_STEPS = 4           # keep >=2 steps per TC after v7x megacore split


def _round_up(n, m):
    return ((n + m - 1) // m) * m


def mlp_kernel(x_ref, w1_ref, b1_ref, w2_ref, b2_ref, o_ref):
    # x_ref:  (TB, 784) bf16    w1_ref: (784, 128) bf16    b1_ref: (1, 128) f32
    # w2_ref: (128, 16) bf16    b2_ref: (1, 16)    f32     o_ref:  (TB, 16) f32
    h = jnp.dot(x_ref[...], w1_ref[...], preferred_element_type=jnp.float32)
    h = jnp.maximum(h + b1_ref[...], 0.0)                    # fc1 + bias + relu
    o_ref[...] = (
        jnp.dot(h.astype(jnp.bfloat16), w2_ref[...],
                preferred_element_type=jnp.float32)
        + b2_ref[...]
    )


def prepare_params(w1, b1, w2, b2):
    """One-time prep: PyTorch-layout weights -> transposed/padded bf16 arrays.

    Call once per parameter update (NOT per forward) so transpose/pad/cast
    work stays off the hot path of MAML inner loops.
      w1: (64, 784)  b1: (64,)  w2: (10, 64)  b2: (10,)
    """
    w1t = jnp.zeros((IN_FEATURES, HIDDEN_PAD), jnp.bfloat16)
    w1t = w1t.at[:, :HIDDEN].set(jnp.transpose(w1).astype(jnp.bfloat16))
    b1r = jnp.zeros((1, HIDDEN_PAD), jnp.float32)
    b1r = b1r.at[0, :HIDDEN].set(b1.astype(jnp.float32))
    w2t = jnp.zeros((HIDDEN_PAD, OUT_PAD), jnp.bfloat16)
    w2t = w2t.at[:HIDDEN, :OUT_FEATURES].set(jnp.transpose(w2).astype(jnp.bfloat16))
    b2r = jnp.zeros((1, OUT_PAD), jnp.float32)
    b2r = b2r.at[0, :OUT_FEATURES].set(b2.astype(jnp.float32))
    return w1t, b1r, w2t, b2r


@functools.partial(jax.jit, static_argnames=("block_b",))
def mlp_forward(x, params, block_b=DEFAULT_BLOCK_B):
    """x: (B, 1, 28, 28) or (B, 784); params from prepare_params()."""
    w1t, b1r, w2t, b2r = params
    B = x.shape[0]
    # Single cheap cast to bf16; NO feature-dim padding of x.
    x2d = x.reshape(B, IN_FEATURES).astype(jnp.bfloat16)

    # Tile size: as large as block_b, but aim for >= MIN_GRID_STEPS grid steps
    # (v7x megacore keeps a full pipeline per TC); multiple of 16 for bf16
    # (16,128) sublane packing. Batch over-padding is at most tb-1 rows.
    tb = max(16, min(block_b, _round_up(pl.cdiv(B, MIN_GRID_STEPS), 16)))
    b_pad = _round_up(B, tb)
    if b_pad != B:
        x2d = jnp.pad(x2d, ((0, b_pad - B), (0, 0)))   # small, bf16, batch-only

    out = pl.pallas_call(
        mlp_kernel,
        out_shape=jax.ShapeDtypeStruct((b_pad, OUT_PAD), jnp.float32),
        grid=(b_pad // tb,),
        in_specs=[
            # x tiles stream through VMEM (auto double-buffered pipeline).
            pl.BlockSpec((tb, IN_FEATURES), lambda i: (i, 0)),
            # Weights / biases: same block every step -> resident in VMEM.
            pl.BlockSpec((IN_FEATURES, HIDDEN_PAD), lambda i: (0, 0)),
            pl.BlockSpec((1, HIDDEN_PAD), lambda i: (0, 0)),
            pl.BlockSpec((HIDDEN_PAD, OUT_PAD), lambda i: (0, 0)),
            pl.BlockSpec((1, OUT_PAD), lambda i: (0, 0)),
        ],
        out_specs=pl.BlockSpec((tb, OUT_PAD), lambda i: (i, 0)),
        compiler_params=pltpu.CompilerParams(
            dimension_semantics=("parallel",),   # shards batch across TCs on v7x
        ),
    )(x2d, w1t, b1r, w2t, b2r)

    # Lazy slice fuses inside this jit; only padded rows/cols are dropped.
    return out[:B, :OUT_FEATURES]


def init_params(key):
    """Deterministic init mimicking nn.Linear's U(-1/sqrt(fan_in), 1/sqrt(fan_in))."""
    k1, k2, k3, k4 = jax.random.split(key, 4)
    lim1 = 1.0 / jnp.sqrt(784.0)
    lim2 = 1.0 / jnp.sqrt(64.0)
    w1 = jax.random.uniform(k1, (64, 784), jnp.float32, -lim1, lim1)
    b1 = jax.random.uniform(k2, (64,), jnp.float32, -lim1, lim1)
    w2 = jax.random.uniform(k3, (10, 64), jnp.float32, -lim2, lim2)
    b2 = jax.random.uniform(k4, (10,), jnp.float32, -lim2, lim2)
    return w1, b1, w2, b2


if __name__ == "__main__":
    key = jax.random.PRNGKey(0)
    kx, kp = jax.random.split(key)

    # Small batch of MNIST-shaped inputs (NCHW), like the PyTorch module expects.
    x = jax.random.normal(kx, (2, 1, 28, 28), jnp.float32)
    w1, b1, w2, b2 = init_params(kp)

    params = prepare_params(w1, b1, w2, b2)   # hoisted one-time weight prep
    out = jax.block_until_ready(mlp_forward(x, params))

    # f32 reference; kernel stores x/weights in bf16 (f32 accumulation), so the
    # tolerance accounts for bf16 input quantization (~0.4% relative).
    x2d = x.reshape(2, 784)
    ref = jnp.maximum(x2d @ w1.T + b1, 0.0) @ w2.T + b2
    assert out.shape == (2, 10)
    assert jnp.allclose(out, ref, atol=5e-2, rtol=5e-2), float(
        jnp.max(jnp.abs(out - ref)))

    print("KERNEL_OK")
</pallas_src>

<mosaic_0001>
module attributes {stable_mosaic.version = 11 : i64} {
  func.func @mlp_kernel(%arg0: i32, %arg1: memref<16x784xbf16, #tpu.memory_space<vmem>>, %arg2: memref<784x128xbf16, #tpu.memory_space<vmem>>, %arg3: memref<1x128xf32, #tpu.memory_space<vmem>>, %arg4: memref<128x16xbf16, #tpu.memory_space<vmem>>, %arg5: memref<1x16xf32, #tpu.memory_space<vmem>>, %arg6: memref<16x16xf32, #tpu.memory_space<vmem>>) attributes {dimension_semantics = [#tpu.dimension_semantics<parallel>], iteration_bounds = array<i64: 1>, scalar_prefetch = 0 : i64, scratch_operands = 0 : i64, tpu.core_type = #tpu.core_type<tc>, window_params = [{transform_indices = @transform_0, window_bounds = array<i64: 16, 784>}, {pipeline_mode = #tpu.pipeline_mode<synchronous>, transform_indices = @transform_1, window_bounds = array<i64: 784, 128>}, {pipeline_mode = #tpu.pipeline_mode<synchronous>, transform_indices = @transform_2, window_bounds = array<i64: 1, 128>}, {pipeline_mode = #tpu.pipeline_mode<synchronous>, transform_indices = @transform_3, window_bounds = array<i64: 128, 16>}, {pipeline_mode = #tpu.pipeline_mode<synchronous>, transform_indices = @transform_4, window_bounds = array<i64: 1, 16>}, {transform_indices = @transform_5, window_bounds = array<i64: 16, 16>}]} {
    %c0 = arith.constant 0 : index
    %c0_0 = arith.constant 0 : index
    %0 = vector.load %arg1[%c0, %c0_0] : memref<16x784xbf16, #tpu.memory_space<vmem>>, vector<16x784xbf16>
    %c0_1 = arith.constant 0 : index
    %c0_2 = arith.constant 0 : index
    %1 = vector.load %arg2[%c0_1, %c0_2] : memref<784x128xbf16, #tpu.memory_space<vmem>>, vector<784x128xbf16>
    %cst = arith.constant dense<0.000000e+00> : vector<16x128xf32>
    %2 = tpu.matmul %0, %1, %cst {dimension_numbers = #tpu.dot_dimension_numbers<[1], [0], [0], [1], [0, 0, 1, 1], [], []>} : vector<16x784xbf16>, vector<784x128xbf16>, vector<16x128xf32> -> vector<16x128xf32>
    %c0_3 = arith.constant 0 : index
    %c0_4 = arith.constant 0 : index
    %3 = vector.load %arg3[%c0_3, %c0_4] : memref<1x128xf32, #tpu.memory_space<vmem>>, vector<1x128xf32>
    %4 = vector.broadcast %3 : vector<1x128xf32> to vector<16x128xf32>
    %5 = arith.addf %2, %4 : vector<16x128xf32>
    %cst_5 = arith.constant 0.000000e+00 : f32
    %6 = vector.broadcast %cst_5 : f32 to vector<16x128xf32>
    %7 = arith.maximumf %5, %6 : vector<16x128xf32>
    %8 = arith.truncf %7 : vector<16x128xf32> to vector<16x128xbf16>
    %c0_6 = arith.constant 0 : index
    %c0_7 = arith.constant 0 : index
    %9 = vector.load %arg4[%c0_6, %c0_7] : memref<128x16xbf16, #tpu.memory_space<vmem>>, vector<128x16xbf16>
    %cst_8 = arith.constant dense<0.000000e+00> : vector<16x16xf32>
    %10 = tpu.matmul %8, %9, %cst_8 {dimension_numbers = #tpu.dot_dimension_numbers<[1], [0], [0], [1], [0, 0, 1, 1], [], []>} : vector<16x128xbf16>, vector<128x16xbf16>, vector<16x16xf32> -> vector<16x16xf32>
    %c0_9 = arith.constant 0 : index
    %c0_10 = arith.constant 0 : index
    %11 = vector.load %arg5[%c0_9, %c0_10] : memref<1x16xf32, #tpu.memory_space<vmem>>, vector<1x16xf32>
    %12 = vector.broadcast %11 : vector<1x16xf32> to vector<16x16xf32>
    %13 = arith.addf %10, %12 : vector<16x16xf32>
    %c0_11 = arith.constant 0 : index
    %c0_12 = arith.constant 0 : index
    %14 = vector.load %arg6[%c0_11, %c0_12] : memref<16x16xf32, #tpu.memory_space<vmem>>, vector<16x16xf32>
    tpu.vector_store %arg6[%c0_11, %c0_12], %13 {strides = array<i32>} : memref<16x16xf32, #tpu.memory_space<vmem>>, vector<16x16xf32>,
    return
  }
  func.func @transform_0(%arg0: i32) -> (i32, i32) {
    %c0_i32 = arith.constant 0 : i32
    %c0_i32_0 = arith.constant 0 : i32
    return %arg0, %c0_i32 : i32, i32
  }
  func.func @transform_1(%arg0: i32) -> (i32, i32) {
    %c0_i32 = arith.constant 0 : i32
    %c0_i32_0 = arith.constant 0 : i32
    %c0_i32_1 = arith.constant 0 : i32
    return %c0_i32, %c0_i32_0 : i32, i32
  }
  func.func @transform_2(%arg0: i32) -> (i32, i32) {
    %c0_i32 = arith.constant 0 : i32
    %c0_i32_0 = arith.constant 0 : i32
    %c0_i32_1 = arith.constant 0 : i32
    return %c0_i32, %c0_i32_0 : i32, i32
  }
  func.func @transform_3(%arg0: i32) -> (i32, i32) {
    %c0_i32 = arith.constant 0 : i32
    %c0_i32_0 = arith.constant 0 : i32
    %c0_i32_1 = arith.constant 0 : i32
    return %c0_i32, %c0_i32_0 : i32, i32
  }
  func.func @transform_4(%arg0: i32) -> (i32, i32) {
    %c0_i32 = arith.constant 0 : i32
    %c0_i32_0 = arith.constant 0 : i32
    %c0_i32_1 = arith.constant 0 : i32
    return %c0_i32, %c0_i32_0 : i32, i32
  }
  func.func @transform_5(%arg0: i32) -> (i32, i32) {
    %c0_i32 = arith.constant 0 : i32
    %c0_i32_0 = arith.constant 0 : i32
    return %arg0, %c0_i32 : i32, i32
  }
}

</mosaic_0001>

<bundles_post_ra>
// kernel: mlp_forward.1
= control target key start
LH: loop header
LB: loop body
LE: loop exit
PB: predicated region body
PF: predicated region fallthrough
CT: control target
= control target key end

     0   :  { %10 = vsyncpa [#allocation3], 0  ;;  %s1031_s18 = smov [#allocation2]   ;;  %s1142_s0 = inlined_call_operand.vmem [shape: bf16[16,784], index: 0, kind: input, shape index: {}]   ;;  %s1143_s1 = inlined_call_operand.hbm [shape: bf16[784,128], index: 1, kind: input, shape index: {}]   ;;  %s1144_s2 = inlined_call_operand.vmem [shape: f32[1,128], index: 2, kind: input, shape index: {}]   ;;  %s1145_s3 = inlined_call_operand.vmem [shape: bf16[128,16], index: 3, kind: input, shape index: {}]   ;;  %s1146_s4 = inlined_call_operand.vmem [shape: f32[1,16], index: 4, kind: input, shape index: {}]   ;;  %s1147_s5 = inlined_call_operand.vmem [shape: f32[16,16], index: 5, kind: output, shape index: {}]  }
   0x1   :  { %s18_s19 = sshll.u32 %s1031_s18, 4  ;;  %s19_s19 = int_to_ptr.vmem [resolvable:$true] %s18_s19 }
   0x2   :  { %s1017_s20 = scalar_lea.vmem %s19_s19, 6272  ;;  %p1022_p1 = scmp.lt.s32.totalorder %s19_s19, %s19_s19 }
   0x3   :  { %p1018_p0 = scmp.ne.s32.totalorder %s19_s19, %s1017_s20  ;;  %p1023_p2 = scmp.lt.s32.totalorder %s1017_s20, %s1017_s20 }
   0x5   :  { %p1024_p3 = por %p1023_p2, %p1022_p1 }
   0x7   :  { %p1025_p4 = pnand %p1024_p3, %p1018_p0 }
   0x9   :  { %1028 = shalt.err (!%p1025_p4)
}
   0xa   :  { %s1032_s21 = smov 64   ;;  %s1033_s22 = smov 4  }
   0xb   :  { %24 = dma.hbm_to_vmem [thread:$0]  %s1143_s1, 6272, %s19_s19, [#allocation3], %s1032_s21, %s1032_s21, %s1033_s22  }
   0xc   :  { %1029 = dma.done.wait [#allocation3], 6272  }
   0xd   :  { %1030 = vsyncadd [#allocation3], 4294961024  ;;  %v942_v0 = vld [vmem:[#allocation2 + $0x78] sm:$0xff]   ;;  %v946_v4 = vld [vmem:[#allocation2 + $0x70] sm:$0xff]   ;;  %v1034_v38 = vmov 0.0   ;;  %vm1035_vm0 = vmmov 0  }
   0xe   :  { %v943_v1 = vld [vmem:[#allocation2 + $0x38] sm:$0xff]   ;;  %834 = vmatprep.subr.bf16.mxu0 %v942_v0  ;;  %v947_v5 = vld [vmem:[#allocation2 + $0x30] sm:$0xff]   ;;  %v950_v8 = vld [vmem:[#allocation2 + $0x68] sm:$0xff]   ;;  %vm477_vm1 = vcmask 130048  }
   0xf   :  { %v944_v2 = vld [vmem:[#allocation2 + $0xf8] sm:$0xff]   ;;  %835 = vmatpush3.bf16.msra.mxu0 %v943_v1  ;;  %v948_v6 = vld [vmem:[#allocation2 + $0xf0] sm:$0xff]   ;;  %v951_v9 = vld [vmem:[#allocation2 + $0x28] sm:$0xff]  }
  0x10   :  { %v945_v3 = vld [vmem:[#allocation2 + $0xb8] sm:$0xff]   ;;  %856 = vmatprep.subr.bf16.mxu1 %v944_v2  ;;  %836 = vmatprep.subr.bf16.mxu0 %v946_v4  ;;  %v949_v7 = vld [vmem:[#allocation2 + $0xb0] sm:$0xff]   ;;  %v952_v10 = vld [vmem:[#allocation2 + $0xe8] sm:$0xff]  }
  0x11   :  { %857 = vmatpush3.bf16.msra.mxu1 %v945_v3  ;;  %v953_v11 = vld [vmem:[#allocation2 + $0xa8] sm:$0xff]   ;;  %v954_v12 = vld [vmem:[#allocation2 + $0x60] sm:$0xff]   ;;  %v958_v16 = vld [vmem:[#allocation2 + $0x58] sm:$0xff]  }
  0x12   :  { %858 = vmatprep.subr.bf16.mxu1 %v948_v6  ;;  %v955_v13 = vld [vmem:[#allocation2 + $0x20] sm:$0xff]   ;;  %v959_v17 = vld [vmem:[#allocation2 + $0x18] sm:$0xff]   ;;  %v962_v20 = vld [vmem:[#allocation2 + $0x50] sm:$0xff]  }
  0x13   :  { %837 = vmatpush3.bf16.msra.mxu0 %v947_v5  ;;  %v956_v14 = vld [vmem:[#allocation2 + $0xe0] sm:$0xff]   ;;  %v960_v18 = vld [vmem:[#allocation2 + $0xd8] sm:$0xff]   ;;  %v963_v21 = vld [vmem:[#allocation2 + $0x10] sm:$0xff]  }
  0x14   :  { %838 = vmatprep.subr.bf16.mxu0 %v950_v8  ;;  %v957_v15 = vld [vmem:[#allocation2 + $0xa0] sm:$0xff]   ;;  %v961_v19 = vld [vmem:[#allocation2 + $0x98] sm:$0xff]   ;;  %v964_v22 = vld [vmem:[#allocation2 + $0xd0] sm:$0xff]  }
  0x15   :  { %859 = vmatpush3.bf16.msra.mxu1 %v949_v7  ;;  %v965_v23 = vld [vmem:[#allocation2 + $0x90] sm:$0xff]   ;;  %v966_v24 = vld [vmem:[#allocation2 + $0x48] sm:$0xff]   ;;  %v970_v28 = vld [vmem:[#allocation2 + $0x40] sm:$0xff]  }
  0x16   :  { %860 = vmatprep.subr.bf16.mxu1 %v952_v10  ;;  %v967_v25 = vld [vmem:[#allocation2 + $0x8] sm:$0xff]   ;;  %v971_v29 = vld [vmem:[#allocation2] sm:$0xff]   ;;  %v977_v34 = vld [vmem:[#allocation2 + $0x178] sm:$0xff]  }
  0x17   :  { %839 = vmatpush3.bf16.msra.mxu0 %v951_v9  ;;  %v968_v26 = vld [vmem:[#allocation2 + $0xc8] sm:$0xff]   ;;  %v972_v30 = vld [vmem:[#allocation2 + $0xc0] sm:$0xff]   ;;  %v981_v37 = vld [vmem:[#allocation2 + $0x138] sm:$0xff]  }
  0x18   :  { %840 = vmatprep.subr.bf16.mxu0 %v954_v12  ;;  %v969_v27 = vld [vmem:[#allocation2 + $0x88] sm:$0xff]   ;;  %v973_v31 = vld [vmem:[%s1142_s0] ss:$28 sps:$4 sm:$0xff]   ;;  %v982_v39 = vld [vmem:[#allocation2 + $0x170] sm:$0xff]  }
  0x19   :  { %861 = vmatpush3.bf16.msra.mxu1 %v953_v11  ;;  %v975_v32 = vld [vmem:[%s1142_s0 + $0x4] ss:$28 sps:$4 sm:$0xff]   ;;  %v980_v36 = vld [vmem:[%s1142_s0 + $0xc] ss:$28 sps:$4 sm:$0xff]   ;;  %v983_v40 = vld [vmem:[#allocation2 + $0x130] sm:$0xff]  }
  0x1a   :  { %862 = vmatprep.subr.bf16.mxu1 %v956_v14  ;;  %v976_v33 = vld [vmem:[#allocation2 + $0x80] sm:$0xff]   ;;  %513 = vmatprep.mubr.bf16.mxu0 %v975_v32  ;;  %v984_v41 = vld [vmem:[#allocation2 + $0x168] sm:$0xff]   ;;  %v988_v45 = vld [vmem:[#allocation2 + $0x158] sm:$0xff]  }
  0x1b   :  { %841 = vmatpush3.bf16.msra.mxu0 %v955_v13  ;;  %v978_v35 = vld [vmem:[%s1142_s0 + $0x8] ss:$28 sps:$4 sm:$0xff]   ;;  %554 = vmatprep.mubr.bf16.mxu1 %v980_v36  ;;  %v989_v46 = vld [vmem:[#allocation2 + $0x118] sm:$0xff]   ;;  %v990_v47 = vld [vmem:[#allocation2 + $0x150] sm:$0xff]  }
  0x1c   :  { %842 = vmatprep.subr.bf16.mxu0 %v958_v16  ;;  %v985_v42 = vld [vmem:[#allocation2 + $0x128] sm:$0xff]   ;;  %v986_v43 = vld [vmem:[#allocation2 + $0x160] sm:$0xff]   ;;  %v991_v49 = vld [vmem:[#allocation2 + $0x110] sm:$0xff]  }
  0x1d   :  { %863 = vmatpush3.bf16.msra.mxu1 %v957_v15  ;;  %v987_v44 = vld [vmem:[#allocation2 + $0x120] sm:$0xff]   ;;  %v999_v50 = vld [vmem:[%s1142_s0 + $0x14] ss:$28 sps:$4 sm:$0xff]   ;;  %v992_v51 = vld [vmem:[#allocation2 + $0x148] sm:$0xff]  }
  0x1e   :  { %864 = vmatprep.subr.bf16.mxu1 %v960_v18  ;;  %v996_v48 = vld [vmem:[#allocation2 + $0x180] sm:$0xff]   ;;  %v1000_v52 = vld [vmem:[%s1142_s0 + $0x18] ss:$28 sps:$4 sm:$0xff]   ;;  %v993_v53 = vld [vmem:[#allocation2 + $0x108] sm:$0xff]  }
  0x1f   :  { %843 = vmatpush3.bf16.msra.mxu0 %v959_v17  ;;  %v994_v54 = vld [vmem:[#allocation2 + $0x140] sm:$0xff]   ;;  %v997_v56 = vld [vmem:[%s1142_s0 + $0x10] ss:$28 sps:$4 sm:$0xff]   ;;  %v1001_v57 = vld [vmem:[%s1145_s3 + $0x38] sm:$0xff]  }
  0x20   :  { %844 = vmatprep.subr.bf16.mxu0 %v962_v20  ;;  %v995_v55 = vld [vmem:[#allocation2 + $0x100] sm:$0xff]   ;;  %v1002_v58 = vld [vmem:[%s1145_s3 + $0x30] sm:$0xff]   ;;  %v1003_v59 = vld [vmem:[%s1145_s3 + $0x28] sm:$0xff]  }
  0x21   :  { %865 = vmatpush3.bf16.msra.mxu1 %v961_v19  ;;  %v1004_v60 = vld [vmem:[%s1145_s3 + $0x20] sm:$0xff]   ;;  %v1005_v61 = vld [vmem:[%s1145_s3 + $0x18] sm:$0xff]   ;;  %v1006_v62 = vld [vmem:[%s1145_s3 + $0x10] sm:$0xff]  }
  0x22   :  { %866 = vmatprep.subr.bf16.mxu1 %v964_v22  ;;  %v1007_v63 = vld [vmem:[%s1145_s3 + $0x8] sm:$0xff]   ;;  %v1008_v0 = vld [vmem:[%s1145_s3] sm:$0xff]  }
  0x23   :  { %845 = vmatpush3.bf16.msra.mxu0 %v963_v21  ;;  %v767_v13 = vld [vmem:[%s1144_s2] ss:$0 sm:$0xff] }
  0x24   :  { %846 = vmatprep.subr.bf16.mxu0 %v966_v24 }
  0x25   :  { %867 = vmatpush3.bf16.msra.mxu1 %v965_v23 }
  0x26   :  { %868 = vmatprep.subr.bf16.mxu1 %v968_v26 }
  0x27   :  { %847 = vmatpush3.bf16.msra.mxu0 %v967_v25 }
  0x28   :  { %848 = vmatprep.subr.bf16.mxu0 %v970_v28 }
  0x29   :  { %869 = vmatpush3.bf16.msra.mxu1 %v969_v27 }
  0x2a   :  { %870 = vmatprep.subr.bf16.mxu1 %v972_v30 }
  0x2b   :  { %849 = vmatpush3.bf16.msra.mxu0 %v971_v29 }
  0x2c   :  { %878 = vmatprep.subr.bf16.mxu0 %v977_v34 }
  0x2d   :  { %871 = vmatpush3.bf16.msra.mxu1 %v976_v33 }
  0x2e   :  { %514 = vmatmul.mubr.bf16.vlgmr.msra.gmra.mxu0 %v973_v31  ;;  %911 = vmatprep.subr.bf16.mxu1 %v1034_v38 }
  0x2f   :  { %879 = vmatpush3.bf16.msra.mxu0 %v981_v37  ;;  %595 = vmatprep.mubr.bf16.mxu0 %v999_v50 }
  0x30   :  { %555 = vmatmul.mubr.bf16.vlgmr.msra.gmra.mxu1 %v978_v35  ;;  %880 = vmatprep.subr.bf16.mxu0 %v982_v39  ;;  %v825_v35 = vld [vmem:[%s1146_s4] ss:$0 sm:$0xff] }
  0x31   :  { %913 = vmatprep.mubr.msk.bf16.mxu1 %vm1035_vm0, %v1034_v38  ;;  %912 = vmatpush3.bf16.msra.mxu1 %v996_v48 }
  0x32   :  { %917 = vmatprep.subr.bf16.mxu1 %v1034_v38 }
  0x33   :  { %881 = vmatpush3.bf16.msra.mxu0 %v983_v40 }
  0x34   :  { %882 = vmatprep.subr.bf16.mxu0 %v984_v41 }
  0x37   :  { %883 = vmatpush3.bf16.msra.mxu0 %v985_v42 }
  0x38   :  { %884 = vmatprep.subr.bf16.mxu0 %v986_v43  ;;  %914 = vmatmul.mubr.msk.bf16.vlgmr.msra.gmra.mxu1 %vm477_vm1, %v1000_v52 }
  0x39   :  { %933 = vmatprep.mubr.msk.bf16.mxu1 %vm1035_vm0, %v1034_v38  ;;  %918 = vmatpush3.bf16.msra.mxu1 %v1001_v57 }
  0x3a   :  { %919 = vmatprep.subr.bf16.mxu1 %v1034_v38 }
  0x3b   :  { %885 = vmatpush3.bf16.msra.mxu0 %v987_v44 }
  0x3c   :  { %886 = vmatprep.subr.bf16.mxu0 %v988_v45 }
  0x3d   :  { %920 = vmatpush3.bf16.msra.mxu1 %v1002_v58 }
  0x3e   :  { %921 = vmatprep.subr.bf16.mxu1 %v1034_v38 }
  0x3f   :  { %887 = vmatpush3.bf16.msra.mxu0 %v989_v46 }
  0x40   :  { %888 = vmatprep.subr.bf16.mxu0 %v990_v47 }
  0x41   :  { %922 = vmatpush3.bf16.msra.mxu1 %v1003_v59 }
  0x42   :  { %923 = vmatprep.subr.bf16.mxu1 %v1034_v38 }
  0x43   :  { %889 = vmatpush3.bf16.msra.mxu0 %v991_v49 }
  0x44   :  { %890 = vmatprep.subr.bf16.mxu0 %v992_v51 }
  0x45   :  { %924 = vmatpush3.bf16.msra.mxu1 %v1004_v60 }
  0x46   :  { %925 = vmatprep.subr.bf16.mxu1 %v1034_v38 }
  0x47   :  { %891 = vmatpush3.bf16.msra.mxu0 %v993_v53 }
  0x48   :  { %892 = vmatprep.subr.bf16.mxu0 %v994_v54 }
  0x49   :  { %926 = vmatpush3.bf16.msra.mxu1 %v1005_v61 }
  0x4a   :  { %927 = vmatprep.subr.bf16.mxu1 %v1034_v38 }
  0x4b   :  { %893 = vmatpush3.bf16.msra.mxu0 %v995_v55 }
  0x4d   :  { %928 = vmatpush3.bf16.msra.mxu1 %v1006_v62 }
  0x4e   :  { %596 = vmatmul.mubr.bf16.vlgmr.msra.gmra.mxu0 %v997_v56  ;;  %929 = vmatprep.subr.bf16.mxu1 %v1034_v38 }
  0x51   :  { %930 = vmatpush3.bf16.msra.mxu1 %v1007_v63 }
  0x52   :  { %931 = vmatprep.subr.bf16.mxu1 %v1034_v38 }
  0x55   :  { %932 = vmatpush3.bf16.msra.mxu1 %v1008_v0 }
  0xee   :  { %v850_v4 = vpop.f32.mrf.mxu0 }
  0xf0   :  { %v872_v1 = vpop.f32.mrf.mxu1  ;;  %v851_v7 = vpop.f32.mrf.mxu0 }
  0xf1   :  { %v852_v12 = vadd.f32 %v851_v7, %v850_v4 }
  0xf2   :  { %v873_v2 = vpop.f32.mrf.mxu1  ;;  %v853_v10 = vpop.f32.mrf.mxu0 }
  0xf3   :  { %v516_v15 = vadd.f32 %v852_v12, %v767_v13  ;;  %v874_v16 = vadd.f32 %v873_v2, %v872_v1 }
  0xf4   :  { %v875_v3 = vpop.f32.mrf.mxu1  ;;  %v854_v14 = vpop.f32.mrf.mxu0 }
  0xf5   :  { %v855_v17 = vadd.f32 %v854_v14, %v853_v10  ;;  %v557_v20 = vadd.f32 %v874_v16, %v516_v15 }
  0xf6   :  { %v876_v5 = vpop.f32.mrf.mxu1 }
  0xf7   :  { %v519_v21 = vadd.f32 %v855_v17, %v767_v13  ;;  %v877_v22 = vadd.f32 %v876_v5, %v875_v3 }
  0xf8   :  { %v638_v6 = vpop.f32.mrf.mxu1 }
  0xf9   :  { %v560_v27 = vadd.f32 %v877_v22, %v519_v21 }
  0xfa   :  { %v915_v8 = vpop.f32.mrf.mxu1 }
  0xfc   :  { %v641_v9 = vpop.f32.mrf.mxu1 }
  0xfe   :  { %v916_v11 = vpop.f32.mrf.mxu1 }
 0x10e   :  { %v894_v18 = vpop.f32.mrf.mxu0 }
 0x110   :  { %v895_v19 = vpop.f32.mrf.mxu0 }
 0x111   :  { %v896_v23 = vadd.f32 %v895_v19, %v894_v18 }
 0x112   :  { %v897_v24 = vpop.f32.mrf.mxu0 }
 0x113   :  { %v598_v25 = vadd.f32 %v896_v23, %v557_v20 }
 0x114   :  { %v898_v26 = vpop.f32.mrf.mxu0 }
 0x115   :  { %v899_v28 = vadd.f32 %v898_v26, %v897_v24  ;;  %v639_v29 = vadd.f32 %v638_v6, %v598_v25 }
 0x117   :  { %v601_v30 = vadd.f32 %v899_v28, %v560_v27  ;;  %v645_v32 = vmax.f32 %v639_v29, 0.0 }
 0x119   :  { %v642_v31 = vadd.f32 %v641_v9, %v601_v30 }
 0x11b   :  { %v646_v33 = vmax.f32 %v642_v31, 0.0 }
 0x11d   :  { %v647_v34 = vpack.c.bf16 %v646_v33, %v645_v32 }
 0x11f   :  { %934 = vmatmul.mubr.bf16.vlgmr.msra.gmra.mxu1 %v647_v34 }
 0x1df   :  { %v753_v36 = vpop.f32.mrf.mxu1 }
 0x1e0   :  { %v754_v37 = vadd.f32 %v825_v35, %v753_v36 }
 0x1e1   :  { %v935_v38 = vpop.f32.mrf.mxu1 }
 0x1e2   :  { %760 = vst.msk [vmem:[%s1147_s5] sm:$0xff] %vm477_vm1, %v754_v37 }
 0x1e3   :  { %v756_v39 = vpop.f32.mrf.mxu1 }
 0x1e4   :  { %v757_v40 = vadd.f32 %v825_v35, %v756_v39 }
 0x1e5   :  { %v936_v41 = vpop.f32.mrf.mxu1 }
 0x1e6   :  { %761 = vst.msk [vmem:[%s1147_s5 + $0x8] sm:$0xff] %vm477_vm1, %v757_v40 }
 0x1e7   :  { %766 = vsyncpa [#allocation3], 1 }

</bundles_post_ra>
